<compile_context>
chip_gen: v7x
topology: tpu7x:2x2x1
jax: 0.10.0
libtpu: 0.0.40
codegen_flags: <defaults>
</compile_context>

<pallas_src>
import jax
import jax.numpy as jnp
from jax.experimental import pallas as pl
from jax.experimental.pallas import tpu as pltpu


def senet_kernel(x_ref, w1_ref, w2_ref, o_ref):
    # x_ref: (TILE_N, C), w1_ref: (C, H), w2_ref: (H, C), o_ref: (TILE_N, C)
    x = x_ref[...]
    # squeeze: x @ W1^T  -- native-dtype operands on the MXU, f32 accumulation
    h = jnp.dot(x, w1_ref[...], preferred_element_type=jnp.float32)
    h = jnp.maximum(h, 0.0)                                   # ReLU
    # excitation: h @ W2^T (cast h back to weight dtype for full-rate MXU)
    g = jnp.dot(h.astype(w2_ref.dtype), w2_ref[...],
                preferred_element_type=jnp.float32)
    g = jax.nn.sigmoid(g)                                     # f32 epilogue
    o_ref[...] = (x.astype(jnp.float32) * g).astype(o_ref.dtype)


def _choose_tile_n(N, C, itemsize, *, max_tile=2048,
                   io_vmem_budget=16 << 20, min_grid_steps=8):
    """Row tile: as large as the VMEM budget allows, multiple of 8, and (when
    possible) an exact divisor of N so no padding/slicing copies are needed."""
    per_row_bytes = 2 * 2 * C * itemsize          # double-buffered x + out tile
    cap = max(8, min(max_tile, io_vmem_budget // max(per_row_bytes, 1)))
    cap = max(8, (cap // 8) * 8)
    if N <= cap:
        return N, 0                               # one full-extent block (legal)
    # keep enough grid steps for v7x's two TensorCores + pipeline overlap
    if N // cap < min_grid_steps:
        cap = max(8, ((N // min_grid_steps) // 8) * 8)
    t = cap
    while t >= 8:
        if N % t == 0:
            return t, 0                           # divides N -> no padding
        t -= 8
    return cap, (-N) % cap                        # rare fallback: pad rows


def senet_forward(x, w1_t, w2_t, *, max_tile=2048):
    """x: (..., C) channel-last; w1_t: (C, H) = W1.T; w2_t: (H, C) = W2.T."""
    orig_shape = x.shape
    C = orig_shape[-1]
    H = w1_t.shape[1]
    x2d = x.reshape(-1, C)
    N = x2d.shape[0]

    itemsize = jnp.dtype(x.dtype).itemsize
    w_itemsize = jnp.dtype(w1_t.dtype).itemsize
    tile_n, pad = _choose_tile_n(N, C, itemsize, max_tile=max_tile)
    if pad:  # rare path: only when no multiple-of-8 tile divides N
        x2d = jnp.concatenate([x2d, jnp.zeros((pad, C), x2d.dtype)], axis=0)
    Np = N + pad
    grid = (Np // tile_n,)

    # Explicit scoped-VMEM budget (default is 16/32 MiB depending on chip);
    # capped at 48 MiB so it is also valid on v7x's 64 MiB physical VMEM.
    io_bytes = 2 * 2 * tile_n * C * itemsize        # double-buffered x + out
    w_bytes = 2 * 2 * C * H * w_itemsize            # both weights, worst case
    scratch = 4 * tile_n * (C + H) * 4              # f32 temporaries headroom
    vmem_limit = int(min(max(io_bytes + w_bytes + scratch + (2 << 20),
                             16 << 20), 48 << 20))

    cost = pl.CostEstimate(
        flops=4 * Np * C * H + Np * C,
        transcendentals=Np * C,
        bytes_accessed=2 * Np * C * itemsize + 2 * C * H * w_itemsize,
    )

    def run(single_buffer_weights):
        w_kwargs = ({"pipeline_mode": pl.Buffered(1)}
                    if single_buffer_weights else {})
        return pl.pallas_call(
            senet_kernel,
            out_shape=jax.ShapeDtypeStruct((Np, C), x.dtype),
            grid_spec=pltpu.PrefetchScalarGridSpec(
                num_scalar_prefetch=0,
                grid=grid,
                in_specs=[
                    pl.BlockSpec((tile_n, C), lambda i: (i, 0)),
                    pl.BlockSpec((C, H), lambda i: (0, 0), **w_kwargs),
                    pl.BlockSpec((H, C), lambda i: (0, 0), **w_kwargs),
                ],
                out_specs=pl.BlockSpec((tile_n, C), lambda i: (i, 0)),
            ),
            compiler_params=pltpu.CompilerParams(
                dimension_semantics=("parallel",),
                vmem_limit_bytes=vmem_limit,
            ),
            cost_estimate=cost,
        )(x2d, w1_t, w2_t)

    try:
        out = run(True)      # weights constant across grid -> single-buffer
    except Exception:        # pipeline_mode unsupported on this jax version
        out = run(False)

    if pad:
        out = out[:N]
    return out.reshape(orig_shape)


def reference_forward(x, w1_t, w2_t):
    g = jnp.maximum(x.astype(jnp.float32) @ w1_t.astype(jnp.float32), 0.0)
    g = g @ w2_t.astype(jnp.float32)
    g = jax.nn.sigmoid(g)
    return (x.astype(jnp.float32) * g).astype(x.dtype)


if __name__ == "__main__":
    # Linear acts on the last (channel) dim; small BERT-like shapes with a
    # lane-dense channel count (multiple of 128).
    B, S, C, RATIO = 2, 8, 128, 8
    H = C // RATIO  # 16

    key = jax.random.PRNGKey(0)
    kx, k1, k2 = jax.random.split(key, 3)

    x = jax.random.normal(kx, (B, S, C), dtype=jnp.float32)

    # PyTorch-style Kaiming-uniform init (bound = 1/sqrt(fan_in)), stored
    # pre-transposed: w1_t = W1.T with W1:(H, C); w2_t = W2.T with W2:(C, H).
    b1 = 1.0 / (C ** 0.5)
    b2 = 1.0 / (H ** 0.5)
    w1_t = jax.random.uniform(k1, (C, H), minval=-b1, maxval=b1,
                              dtype=jnp.float32)
    w2_t = jax.random.uniform(k2, (H, C), minval=-b2, maxval=b2,
                              dtype=jnp.float32)

    out = jax.block_until_ready(senet_forward(x, w1_t, w2_t))

    ref = reference_forward(x, w1_t, w2_t)
    assert out.shape == x.shape and out.dtype == x.dtype
    assert jnp.allclose(out, ref, atol=1e-4, rtol=1e-4)

    print("KERNEL_OK")
</pallas_src>

<mosaic_0001>
module attributes {stable_mosaic.version = 11 : i64} {
  func.func @senet_kernel(%arg0: i32, %arg1: memref<16x128xf32, #tpu.memory_space<vmem>>, %arg2: memref<128x16xf32, #tpu.memory_space<vmem>>, %arg3: memref<16x128xf32, #tpu.memory_space<vmem>>, %arg4: memref<16x128xf32, #tpu.memory_space<vmem>>) attributes {dimension_semantics = [#tpu.dimension_semantics<parallel>], iteration_bounds = array<i64: 1>, scalar_prefetch = 0 : i64, scratch_operands = 0 : i64, tpu.core_type = #tpu.core_type<tc>, window_params = [{transform_indices = @transform_0, window_bounds = array<i64: 16, 128>}, {pipeline_mode = #tpu.pipeline_mode<synchronous>, transform_indices = @transform_1, window_bounds = array<i64: 128, 16>}, {pipeline_mode = #tpu.pipeline_mode<synchronous>, transform_indices = @transform_2, window_bounds = array<i64: 16, 128>}, {transform_indices = @transform_3, window_bounds = array<i64: 16, 128>}]} {
    %c0 = arith.constant 0 : index
    %c0_0 = arith.constant 0 : index
    %0 = vector.load %arg1[%c0, %c0_0] : memref<16x128xf32, #tpu.memory_space<vmem>>, vector<16x128xf32>
    %c0_1 = arith.constant 0 : index
    %c0_2 = arith.constant 0 : index
    %1 = vector.load %arg2[%c0_1, %c0_2] : memref<128x16xf32, #tpu.memory_space<vmem>>, vector<128x16xf32>
    %cst = arith.constant dense<0.000000e+00> : vector<16x16xf32>
    %2 = tpu.matmul %0, %1, %cst {dimension_numbers = #tpu.dot_dimension_numbers<[1], [0], [0], [1], [0, 0, 1, 1], [], []>} : vector<16x128xf32>, vector<128x16xf32>, vector<16x16xf32> -> vector<16x16xf32>
    %cst_3 = arith.constant 0.000000e+00 : f32
    %3 = vector.broadcast %cst_3 : f32 to vector<16x16xf32>
    %4 = arith.maximumf %2, %3 : vector<16x16xf32>
    %c0_4 = arith.constant 0 : index
    %c0_5 = arith.constant 0 : index
    %5 = vector.load %arg3[%c0_4, %c0_5] : memref<16x128xf32, #tpu.memory_space<vmem>>, vector<16x128xf32>
    %cst_6 = arith.constant dense<0.000000e+00> : vector<16x128xf32>
    %6 = tpu.matmul %4, %5, %cst_6 {dimension_numbers = #tpu.dot_dimension_numbers<[1], [0], [0], [1], [0, 0, 1, 1], [], []>} : vector<16x16xf32>, vector<16x128xf32>, vector<16x128xf32> -> vector<16x128xf32>
    %7 = arith.negf %6 : vector<16x128xf32>
    %8 = math.exp %7 : vector<16x128xf32>
    %cst_7 = arith.constant 1.000000e+00 : f32
    %9 = vector.broadcast %cst_7 : f32 to vector<16x128xf32>
    %10 = arith.addf %9, %8 : vector<16x128xf32>
    %11 = arith.divf %9, %10 : vector<16x128xf32>
    %12 = arith.mulf %0, %11 : vector<16x128xf32>
    %c0_8 = arith.constant 0 : index
    %c0_9 = arith.constant 0 : index
    %13 = vector.load %arg4[%c0_8, %c0_9] : memref<16x128xf32, #tpu.memory_space<vmem>>, vector<16x128xf32>
    tpu.vector_store %arg4[%c0_8, %c0_9], %12 {strides = array<i32>} : memref<16x128xf32, #tpu.memory_space<vmem>>, vector<16x128xf32>,
    return
  }
  func.func @transform_0(%arg0: i32) -> (i32, i32) {
    %c0_i32 = arith.constant 0 : i32
    %c0_i32_0 = arith.constant 0 : i32
    return %arg0, %c0_i32 : i32, i32
  }
  func.func @transform_1(%arg0: i32) -> (i32, i32) {
    %c0_i32 = arith.constant 0 : i32
    %c0_i32_0 = arith.constant 0 : i32
    %c0_i32_1 = arith.constant 0 : i32
    return %c0_i32, %c0_i32_0 : i32, i32
  }
  func.func @transform_2(%arg0: i32) -> (i32, i32) {
    %c0_i32 = arith.constant 0 : i32
    %c0_i32_0 = arith.constant 0 : i32
    %c0_i32_1 = arith.constant 0 : i32
    return %c0_i32, %c0_i32_0 : i32, i32
  }
  func.func @transform_3(%arg0: i32) -> (i32, i32) {
    %c0_i32 = arith.constant 0 : i32
    %c0_i32_0 = arith.constant 0 : i32
    return %arg0, %c0_i32 : i32, i32
  }
}

module attributes {stable_mosaic.version = 11 : i64} {
  func.func @senet_kernel(%arg0: i32, %arg1: memref<16x128xf32, #tpu.memory_space<vmem>>, %arg2: memref<128x16xf32, #tpu.memory_space<vmem>>, %arg3: memref<16x128xf32, #tpu.memory_space<vmem>>, %arg4: memref<16x128xf32, #tpu.memory_space<vmem>>) attributes {dimension_semantics = [#tpu.dimension_semantics<parallel>], iteration_bounds = array<i64: 1>, scalar_prefetch = 0 : i64, scratch_operands = 0 : i64, tpu.core_type = #tpu.core_type<tc>, window_params = [{transform_indices = @transform_0, window_bounds = array<i64: 16, 128>}, {pipeline_mode = #tpu.pipeline_mode<synchronous>, transform_indices = @transform_1, window_bounds = array<i64: 128, 16>}, {pipeline_mode = #tpu.pipeline_mode<synchronous>, transform_indices = @transform_2, window_bounds = array<i64: 16, 128>}, {transform_indices = @transform_3, window_bounds = array<i64: 16, 128>}]} {
    %c0 = arith.constant 0 : index
    %c0_0 = arith.constant 0 : index
    %0 = vector.load %arg1[%c0, %c0_0] : memref<16x128xf32, #tpu.memory_space<vmem>>, vector<16x128xf32>
    %c0_1 = arith.constant 0 : index
    %c0_2 = arith.constant 0 : index
    %1 = vector.load %arg2[%c0_1, %c0_2] : memref<128x16xf32, #tpu.memory_space<vmem>>, vector<128x16xf32>
    %cst = arith.constant dense<0.000000e+00> : vector<16x16xf32>
    %2 = tpu.matmul %0, %1, %cst {dimension_numbers = #tpu.dot_dimension_numbers<[1], [0], [0], [1], [0, 0, 1, 1], [], []>} : vector<16x128xf32>, vector<128x16xf32>, vector<16x16xf32> -> vector<16x16xf32>
    %cst_3 = arith.constant 0.000000e+00 : f32
    %3 = vector.broadcast %cst_3 : f32 to vector<16x16xf32>
    %4 = arith.maximumf %2, %3 : vector<16x16xf32>
    %c0_4 = arith.constant 0 : index
    %c0_5 = arith.constant 0 : index
    %5 = vector.load %arg3[%c0_4, %c0_5] : memref<16x128xf32, #tpu.memory_space<vmem>>, vector<16x128xf32>
    %cst_6 = arith.constant dense<0.000000e+00> : vector<16x128xf32>
    %6 = tpu.matmul %4, %5, %cst_6 {dimension_numbers = #tpu.dot_dimension_numbers<[1], [0], [0], [1], [0, 0, 1, 1], [], []>} : vector<16x16xf32>, vector<16x128xf32>, vector<16x128xf32> -> vector<16x128xf32>
    %7 = arith.negf %6 : vector<16x128xf32>
    %8 = math.exp %7 : vector<16x128xf32>
    %cst_7 = arith.constant 1.000000e+00 : f32
    %9 = vector.broadcast %cst_7 : f32 to vector<16x128xf32>
    %10 = arith.addf %9, %8 : vector<16x128xf32>
    %11 = arith.divf %9, %10 : vector<16x128xf32>
    %12 = arith.mulf %0, %11 : vector<16x128xf32>
    %c0_8 = arith.constant 0 : index
    %c0_9 = arith.constant 0 : index
    %13 = vector.load %arg4[%c0_8, %c0_9] : memref<16x128xf32, #tpu.memory_space<vmem>>, vector<16x128xf32>
    tpu.vector_store %arg4[%c0_8, %c0_9], %12 {strides = array<i32>} : memref<16x128xf32, #tpu.memory_space<vmem>>, vector<16x128xf32>,
    return
  }
  func.func @transform_0(%arg0: i32) -> (i32, i32) {
    %c0_i32 = arith.constant 0 : i32
    %c0_i32_0 = arith.constant 0 : i32
    return %arg0, %c0_i32 : i32, i32
  }
  func.func @transform_1(%arg0: i32) -> (i32, i32) {
    %c0_i32 = arith.constant 0 : i32
    %c0_i32_0 = arith.constant 0 : i32
    %c0_i32_1 = arith.constant 0 : i32
    return %c0_i32, %c0_i32_0 : i32, i32
  }
  func.func @transform_2(%arg0: i32) -> (i32, i32) {
    %c0_i32 = arith.constant 0 : i32
    %c0_i32_0 = arith.constant 0 : i32
    %c0_i32_1 = arith.constant 0 : i32
    return %c0_i32, %c0_i32_0 : i32, i32
  }
  func.func @transform_3(%arg0: i32) -> (i32, i32) {
    %c0_i32 = arith.constant 0 : i32
    %c0_i32_0 = arith.constant 0 : i32
    return %arg0, %c0_i32 : i32, i32
  }
}

</mosaic_0001>

<bundles_post_ra>
// kernel: tpu_custom_call.1
= control target key start
LH: loop header
LB: loop body
LE: loop exit
PB: predicated region body
PF: predicated region fallthrough
CT: control target
= control target key end

     0   :  { %s464_s0 = inlined_call_operand.vmem [shape: f32[16,128], index: 0, kind: input, shape index: {}]   ;;  %s465_s1 = inlined_call_operand.vmem [shape: f32[128,16], index: 1, kind: input, shape index: {}]   ;;  %s466_s2 = inlined_call_operand.vmem [shape: f32[16,128], index: 2, kind: input, shape index: {}]   ;;  %s467_s3 = inlined_call_operand.hbm [shape: f32[16,128], index: 3, kind: output, shape index: {}]  }
   0x1   :  { %v17_v0 = vld [vmem:[%s465_s1] sm:$0xff]  ;;  %v18_v1 = vld [vmem:[%s465_s1 + $0x8] sm:$0xff]  ;;  %v19_v2 = vld [vmem:[%s465_s1 + $0x10] sm:$0xff] }
   0x2   :  { %v294_v3 = vpack.c.bf16 %v18_v1, %v17_v0  ;;  %v20_v4 = vld [vmem:[%s465_s1 + $0x18] sm:$0xff]  ;;  %v21_v6 = vld [vmem:[%s465_s1 + $0x20] sm:$0xff]  ;;  %v22_v7 = vld [vmem:[%s465_s1 + $0x28] sm:$0xff] }
   0x3   :  { %v298_v5 = vpack.c.bf16 %v20_v4, %v19_v2  ;;  %v302_v8 = vpack.c.bf16 %v22_v7, %v21_v6  ;;  %v409_v9 = vld [vmem:[%s464_s0] sm:$0xff]  ;;  %v23_v10 = vld [vmem:[%s465_s1 + $0x30] sm:$0xff]  ;;  %v24_v11 = vld [vmem:[%s465_s1 + $0x38] sm:$0xff] }
   0x4   :  { %295 = vmatprep.subr.bf16.mxu0 %v294_v3  ;;  %284 = vmatprep.mubr.f32.mxu0 %v409_v9 }
   0x5   :  { %297 = vmatpush3.bf16.msra.mxu0 %v294_v3 }
   0x6   :  { %299 = vmatprep.subr.bf16.mxu0 %v298_v5 }
   0x7   :  { %8 = vsyncpa [#allocation3], 0  ;;  %v306_v12 = vpack.c.bf16 %v24_v11, %v23_v10  ;;  %v25_v13 = vld [vmem:[%s465_s1 + $0x40] sm:$0xff]  ;;  %v26_v14 = vld [vmem:[%s465_s1 + $0x48] sm:$0xff]  ;;  %vm112_vm0 = vcmask 130048  }
   0x8   :  { %v310_v15 = vpack.c.bf16 %v26_v14, %v25_v13  ;;  %v27_v16 = vld [vmem:[%s465_s1 + $0x50] sm:$0xff]  ;;  %v28_v17 = vld [vmem:[%s465_s1 + $0x58] sm:$0xff]  ;;  %v29_v19 = vld [vmem:[%s465_s1 + $0x60] sm:$0xff] }
   0x9   :  { %301 = vmatpush3.bf16.msra.mxu0 %v298_v5  ;;  %v314_v18 = vpack.c.bf16 %v28_v17, %v27_v16  ;;  %v30_v20 = vld [vmem:[%s465_s1 + $0x68] sm:$0xff]  ;;  %v31_v22 = vld [vmem:[%s465_s1 + $0x70] sm:$0xff]  ;;  %v32_v23 = vld [vmem:[%s465_s1 + $0x78] sm:$0xff] }
   0xa   :  { %303 = vmatprep.subr.bf16.mxu0 %v302_v8  ;;  %v318_v21 = vpack.c.bf16 %v30_v20, %v29_v19  ;;  %v322_v24 = vpack.c.bf16 %v32_v23, %v31_v22  ;;  %v16_v25 = vld [vmem:[%s464_s0 + $0x8] sm:$0xff]  ;;  %v110_v26 = vld [vmem:[%s466_s2] sm:$0xff]  ;;  %s365_s0 = smov [#allocation2]  }
   0xb   :  { %v111_v27 = vld [vmem:[%s466_s2 + $0x8] sm:$0xff]  ;;  %s215_s1 = sshll.u32 %s365_s0, 4  ;;  %s216_s1 = int_to_ptr.vmem [resolvable:$true] %s215_s1 }
   0xc   :  { %v326_v28 = vpack.c.bf16 %v111_v27, %v110_v26  ;;  %s341_s2 = scalar_lea.vmem %s216_s1, 256  ;;  %p346_p1 = scmp.lt.s32.totalorder %s216_s1, %s216_s1 }
   0xd   :  { %305 = vmatpush3.bf16.msra.mxu0 %v302_v8  ;;  %p342_p0 = scmp.ne.s32.totalorder %s216_s1, %s341_s2  ;;  %p347_p2 = scmp.lt.s32.totalorder %s341_s2, %s341_s2 }
   0xe   :  { %307 = vmatprep.subr.bf16.mxu0 %v306_v12  ;;  %327 = vmatprep.subr.bf16.mxu1 %v326_v28 }
   0xf   :  { %329 = vmatpush3.bf16.msra.mxu1 %v326_v28  ;;  %p348_p3 = por %p347_p2, %p346_p1 }
  0x11   :  { %309 = vmatpush3.bf16.msra.mxu0 %v306_v12  ;;  %p349_p4 = pnand %p348_p3, %p342_p0 }
  0x12   :  { %311 = vmatprep.subr.bf16.mxu0 %v310_v15 }
  0x15   :  { %313 = vmatpush3.bf16.msra.mxu0 %v310_v15 }
  0x16   :  { %315 = vmatprep.subr.bf16.mxu0 %v314_v18 }
  0x19   :  { %317 = vmatpush3.bf16.msra.mxu0 %v314_v18 }
  0x1a   :  { %319 = vmatprep.subr.bf16.mxu0 %v318_v21 }
  0x1d   :  { %321 = vmatpush3.bf16.msra.mxu0 %v318_v21 }
  0x1e   :  { %323 = vmatprep.subr.bf16.mxu0 %v322_v24 }
  0x21   :  { %325 = vmatpush3.bf16.msra.mxu0 %v322_v24 }
  0x24   :  { %285 = vmatmul.mubr.f32.vlgmr.msra.gmra.mrb[0].mxu0 %v16_v25 }
  0xf7   :  { %v286_v29 = vpop.f32.mrb[0].mxu0 }
  0xf8   :  { %v99_v30 = vpop.f32.mrb[1].mxu0  ;;  %v109_v32 = vmax.f32 %v286_v29, 0.0 }
  0xf9   :  { %v108_v31 = vmax.f32 %v99_v30, 0.0 }
  0xfb   :  { %291 = vmatprep.mubr.msk.f32.mxu1 %vm112_vm0, %v108_v31 }
  0xfc   :  { %292 = vmatmul.mubr.msk.f32.vlgmr.msra.gmra.mrb[0].mxu1 %vm112_vm0, %v109_v32 }
 0x1cf   :  { %v293_v33 = vpop.f32.mrb[0].mxu1 }
 0x1d0   :  { %v229_v34 = vmul.f32 -1.442695, %v293_v33  ;;  %v185_v35 = vpop.f32.mrb[1].mxu1 }
 0x1d1   :  { %v228_v36 = vmul.f32 -1.442695, %v185_v35 }
 0x1d2   :  { %333 = vpow2.f32 %v229_v34 }
 0x1d3   :  { %335 = vpow2.f32 %v228_v36 }
 0x1dc   :  { %v334_v37 = vpop.eup %333 }
 0x1dd   :  { %v336_v38 = vpop.eup %335  ;;  %v201_v39 = vadd.f32 1.0, %v334_v37 }
 0x1de   :  { %v200_v40 = vadd.f32 1.0, %v336_v38 }
 0x1df   :  { %337 = vrcp.f32 %v201_v39 }
 0x1e0   :  { %339 = vrcp.f32 %v200_v40 }
 0x1e9   :  { %v338_v41 = vpop.eup %337 }
 0x1ea   :  { %v340_v42 = vpop.eup %339  ;;  %v207_v43 = vmul.f32 %v338_v41, %v16_v25 }
 0x1eb   :  { %v206_v44 = vmul.f32 %v340_v42, %v409_v9 }
 0x1ec   :  { %209 = vst [vmem:[#allocation2 + $0x8] sm:$0xff] %v207_v43 }
 0x1ed   :  { %208 = vst [vmem:[#allocation2] sm:$0xff] %v206_v44 }
 0x1ee   :  { %352 = shalt.err (!%p349_p4)
}
 0x1ef   :  { %s353_s27 = scalar_lea.hbm %s467_s3, 256 }
 0x1f0   :  { %p354_p5 = scmp.ne.s32.totalorder %s467_s3, %s353_s27  ;;  %p357_p6 = scmp.lt.u32.totalorder %s353_s27, %s467_s3 }
 0x1f2   :  { %p359_p7 = pnand %p357_p6, %p354_p5 }
 0x1f4   :  { %362 = shalt.err (!%p359_p7)
}
 0x1f5   :  { %s366_s5 = smov 128   ;;  %s367_s6 = smov 8  }
 0x1f6   :  { %221 = dma.vmem_to_hbm [thread:$0]  %s216_s1, 256, %s467_s3, [#allocation3], %s366_s5, %s366_s5, %s367_s6  }
 0x1f7   :  { %363 = dma.done.wait [#allocation3], 256  }
 0x1f8   :  { %364 = vsyncadd [#allocation3], 4294967040 }
 0x1f9   :  { %225 = vsyncpa [#allocation3], 1 }

// kernel: tpu_custom_call.1
= control target key start
LH: loop header
LB: loop body
LE: loop exit
PB: predicated region body
PF: predicated region fallthrough
CT: control target
= control target key end

     0   :  { %s464_s0 = inlined_call_operand.vmem [shape: f32[16,128], index: 0, kind: input, shape index: {}]   ;;  %s465_s1 = inlined_call_operand.vmem [shape: f32[128,16], index: 1, kind: input, shape index: {}]   ;;  %s466_s2 = inlined_call_operand.vmem [shape: f32[16,128], index: 2, kind: input, shape index: {}]   ;;  %s467_s3 = inlined_call_operand.hbm [shape: f32[16,128], index: 3, kind: output, shape index: {}]  }
   0x1   :  { %v17_v0 = vld [vmem:[%s465_s1] sm:$0xff]  ;;  %v18_v1 = vld [vmem:[%s465_s1 + $0x8] sm:$0xff]  ;;  %v19_v2 = vld [vmem:[%s465_s1 + $0x10] sm:$0xff] }
   0x2   :  { %v294_v3 = vpack.c.bf16 %v18_v1, %v17_v0  ;;  %v20_v4 = vld [vmem:[%s465_s1 + $0x18] sm:$0xff]  ;;  %v21_v6 = vld [vmem:[%s465_s1 + $0x20] sm:$0xff]  ;;  %v22_v7 = vld [vmem:[%s465_s1 + $0x28] sm:$0xff] }
   0x3   :  { %v298_v5 = vpack.c.bf16 %v20_v4, %v19_v2  ;;  %v302_v8 = vpack.c.bf16 %v22_v7, %v21_v6  ;;  %v409_v9 = vld [vmem:[%s464_s0] sm:$0xff]  ;;  %v23_v10 = vld [vmem:[%s465_s1 + $0x30] sm:$0xff]  ;;  %v24_v11 = vld [vmem:[%s465_s1 + $0x38] sm:$0xff] }
   0x4   :  { %295 = vmatprep.subr.bf16.mxu0 %v294_v3  ;;  %284 = vmatprep.mubr.f32.mxu0 %v409_v9 }
   0x5   :  { %297 = vmatpush3.bf16.msra.mxu0 %v294_v3 }
   0x6   :  { %299 = vmatprep.subr.bf16.mxu0 %v298_v5 }
   0x7   :  { %8 = vsyncpa [#allocation3], 0  ;;  %v306_v12 = vpack.c.bf16 %v24_v11, %v23_v10  ;;  %v25_v13 = vld [vmem:[%s465_s1 + $0x40] sm:$0xff]  ;;  %v26_v14 = vld [vmem:[%s465_s1 + $0x48] sm:$0xff]  ;;  %vm112_vm0 = vcmask 130048  }
   0x8   :  { %v310_v15 = vpack.c.bf16 %v26_v14, %v25_v13  ;;  %v27_v16 = vld [vmem:[%s465_s1 + $0x50] sm:$0xff]  ;;  %v28_v17 = vld [vmem:[%s465_s1 + $0x58] sm:$0xff]  ;;  %v29_v19 = vld [vmem:[%s465_s1 + $0x60] sm:$0xff] }
   0x9   :  { %301 = vmatpush3.bf16.msra.mxu0 %v298_v5  ;;  %v314_v18 = vpack.c.bf16 %v28_v17, %v27_v16  ;;  %v30_v20 = vld [vmem:[%s465_s1 + $0x68] sm:$0xff]  ;;  %v31_v22 = vld [vmem:[%s465_s1 + $0x70] sm:$0xff]  ;;  %v32_v23 = vld [vmem:[%s465_s1 + $0x78] sm:$0xff] }
   0xa   :  { %303 = vmatprep.subr.bf16.mxu0 %v302_v8  ;;  %v318_v21 = vpack.c.bf16 %v30_v20, %v29_v19  ;;  %v322_v24 = vpack.c.bf16 %v32_v23, %v31_v22  ;;  %v16_v25 = vld [vmem:[%s464_s0 + $0x8] sm:$0xff]  ;;  %v110_v26 = vld [vmem:[%s466_s2] sm:$0xff]  ;;  %s365_s0 = smov [#allocation2]  }
   0xb   :  { %v111_v27 = vld [vmem:[%s466_s2 + $0x8] sm:$0xff]  ;;  %s215_s1 = sshll.u32 %s365_s0, 4  ;;  %s216_s1 = int_to_ptr.vmem [resolvable:$true] %s215_s1 }
   0xc   :  { %v326_v28 = vpack.c.bf16 %v111_v27, %v110_v26  ;;  %s341_s2 = scalar_lea.vmem %s216_s1, 256  ;;  %p346_p1 = scmp.lt.s32.totalorder %s216_s1, %s216_s1 }
   0xd   :  { %305 = vmatpush3.bf16.msra.mxu0 %v302_v8  ;;  %p342_p0 = scmp.ne.s32.totalorder %s216_s1, %s341_s2  ;;  %p347_p2 = scmp.lt.s32.totalorder %s341_s2, %s341_s2 }
   0xe   :  { %307 = vmatprep.subr.bf16.mxu0 %v306_v12  ;;  %327 = vmatprep.subr.bf16.mxu1 %v326_v28 }
   0xf   :  { %329 = vmatpush3.bf16.msra.mxu1 %v326_v28  ;;  %p348_p3 = por %p347_p2, %p346_p1 }
  0x11   :  { %309 = vmatpush3.bf16.msra.mxu0 %v306_v12  ;;  %p349_p4 = pnand %p348_p3, %p342_p0 }
  0x12   :  { %311 = vmatprep.subr.bf16.mxu0 %v310_v15 }
  0x15   :  { %313 = vmatpush3.bf16.msra.mxu0 %v310_v15 }
  0x16   :  { %315 = vmatprep.subr.bf16.mxu0 %v314_v18 }
  0x19   :  { %317 = vmatpush3.bf16.msra.mxu0 %v314_v18 }
  0x1a   :  { %319 = vmatprep.subr.bf16.mxu0 %v318_v21 }
  0x1d   :  { %321 = vmatpush3.bf16.msra.mxu0 %v318_v21 }
  0x1e   :  { %323 = vmatprep.subr.bf16.mxu0 %v322_v24 }
  0x21   :  { %325 = vmatpush3.bf16.msra.mxu0 %v322_v24 }
  0x24   :  { %285 = vmatmul.mubr.f32.vlgmr.msra.gmra.mrb[0].mxu0 %v16_v25 }
  0xf7   :  { %v286_v29 = vpop.f32.mrb[0].mxu0 }
  0xf8   :  { %v99_v30 = vpop.f32.mrb[1].mxu0  ;;  %v109_v32 = vmax.f32 %v286_v29, 0.0 }
  0xf9   :  { %v108_v31 = vmax.f32 %v99_v30, 0.0 }
  0xfb   :  { %291 = vmatprep.mubr.msk.f32.mxu1 %vm112_vm0, %v108_v31 }
  0xfc   :  { %292 = vmatmul.mubr.msk.f32.vlgmr.msra.gmra.mrb[0].mxu1 %vm112_vm0, %v109_v32 }
 0x1cf   :  { %v293_v33 = vpop.f32.mrb[0].mxu1 }
 0x1d0   :  { %v229_v34 = vmul.f32 -1.442695, %v293_v33  ;;  %v185_v35 = vpop.f32.mrb[1].mxu1 }
 0x1d1   :  { %v228_v36 = vmul.f32 -1.442695, %v185_v35 }
 0x1d2   :  { %333 = vpow2.f32 %v229_v34 }
 0x1d3   :  { %335 = vpow2.f32 %v228_v36 }
 0x1dc   :  { %v334_v37 = vpop.eup %333 }
 0x1dd   :  { %v336_v38 = vpop.eup %335  ;;  %v201_v39 = vadd.f32 1.0, %v334_v37 }
 0x1de   :  { %v200_v40 = vadd.f32 1.0, %v336_v38 }
 0x1df   :  { %337 = vrcp.f32 %v201_v39 }
 0x1e0   :  { %339 = vrcp.f32 %v200_v40 }
 0x1e9   :  { %v338_v41 = vpop.eup %337 }
 0x1ea   :  { %v340_v42 = vpop.eup %339  ;;  %v207_v43 = vmul.f32 %v338_v41, %v16_v25 }
 0x1eb   :  { %v206_v44 = vmul.f32 %v340_v42, %v409_v9 }
 0x1ec   :  { %209 = vst [vmem:[#allocation2 + $0x8] sm:$0xff] %v207_v43 }
 0x1ed   :  { %208 = vst [vmem:[#allocation2] sm:$0xff] %v206_v44 }
 0x1ee   :  { %352 = shalt.err (!%p349_p4)
}
 0x1ef   :  { %s353_s27 = scalar_lea.hbm %s467_s3, 256 }
 0x1f0   :  { %p354_p5 = scmp.ne.s32.totalorder %s467_s3, %s353_s27  ;;  %p357_p6 = scmp.lt.u32.totalorder %s353_s27, %s467_s3 }
 0x1f2   :  { %p359_p7 = pnand %p357_p6, %p354_p5 }
 0x1f4   :  { %362 = shalt.err (!%p359_p7)
}
 0x1f5   :  { %s366_s5 = smov 128   ;;  %s367_s6 = smov 8  }
 0x1f6   :  { %221 = dma.vmem_to_hbm [thread:$0]  %s216_s1, 256, %s467_s3, [#allocation3], %s366_s5, %s366_s5, %s367_s6  }
 0x1f7   :  { %363 = dma.done.wait [#allocation3], 256  }
 0x1f8   :  { %364 = vsyncadd [#allocation3], 4294967040 }
 0x1f9   :  { %225 = vsyncpa [#allocation3], 1 }

</bundles_post_ra>
